<compile_context>
chip_gen: v6e
topology: v6e:2x2x1
jax: 0.10.0
libtpu: 0.0.40
codegen_flags: <defaults>
</compile_context>

<pallas_src>
import functools
import math

import jax
import jax.numpy as jnp
from jax.experimental import pallas as pl
from jax.experimental.pallas import tpu as pltpu


def _label_smoothing_kernel(x_ref, tgt_ref, out_ref, *, padding_idx,
                            smooth_val, confidence):
    # x_ref: (TN, V), tgt_ref: (TN, 1) int32, out_ref: (1, 8, 128) f32
    x = x_ref[...].astype(jnp.float32)
    tgt = tgt_ref[...]                                   # (TN, 1)
    tn, v = x.shape

    # Row-wise logsumexp (max -> XLU, exp -> EUP, sum -> XLU).
    m = jnp.max(x, axis=1, keepdims=True)                # (TN, 1)
    lse = m + jnp.log(jnp.sum(jnp.exp(x - m), axis=1, keepdims=True))

    # Smoothed-target weights w: confidence at the target column, s elsewhere,
    # 0 at the padding column.  sum_v(w) == 1, so
    #   cross = sum(td * logp) = sum(w * x) - lse
    # with a single weighted full-tile reduction.
    col = jax.lax.broadcasted_iota(jnp.int32, (tn, v), 1)
    w = jnp.where(col == tgt, jnp.float32(confidence), jnp.float32(smooth_val))
    w = jnp.where(col == padding_idx, jnp.float32(0.0), w)
    wx = jnp.sum(w * x, axis=1, keepdims=True)           # (TN, 1)

    cross = wx - lse
    # Rows whose target is padding_idx (incl. wrapper-added padding rows)
    # contribute zero, matching masked_fill_ in the PyTorch module.
    per_row = jnp.where(tgt != padding_idx, -cross, jnp.float32(0.0))

    # Lane-dense, unmasked vreg store of this block's partial sum.
    out_ref[...] = jnp.full((1, 8, 128), jnp.sum(per_row), dtype=jnp.float32)


def label_smoothing_loss(x, target, *, size, padding_idx, smoothing=0.1,
                         block_rows=None):
    """Pallas implementation of LabelSmoothingLoss.forward(x, target)."""
    n, v = x.shape
    assert v == size, "x.shape[1] must equal size"
    if smoothing > 0.0:
        assert size > 2, "label smoothing requires size > 2"
    confidence = 1.0 - smoothing
    smooth_val = smoothing / (size - 2) if size > 2 else 0.0

    itemsize = jnp.dtype(x.dtype).itemsize
    if block_rows is None:
        # ~4 MiB per x block per pipeline buffer -> ~8 MiB double-buffered,
        # safely inside every generation's default scoped VMEM.
        budget = 4 * 1024 * 1024
        rows = max(1, budget // max(1, v * itemsize))
        rows = min(rows, 1024, n)
        block_rows = max(8, (rows // 8) * 8)

    num_blocks = pl.cdiv(n, block_rows)
    n_pad = num_blocks * block_rows
    if n_pad != n:
        x = jnp.pad(x, ((0, n_pad - n), (0, 0)))
        target_p = jnp.pad(target.astype(jnp.int32), (0, n_pad - n),
                           constant_values=padding_idx)
    else:
        target_p = target.astype(jnp.int32)
    tgt2d = target_p.reshape(n_pad, 1)

    kernel = functools.partial(
        _label_smoothing_kernel,
        padding_idx=padding_idx, smooth_val=smooth_val, confidence=confidence)

    partials = pl.pallas_call(
        kernel,
        out_shape=jax.ShapeDtypeStruct((num_blocks, 8, 128), jnp.float32),
        grid_spec=pltpu.PrefetchScalarGridSpec(
            num_scalar_prefetch=0,
            grid=(num_blocks,),
            in_specs=[
                pl.BlockSpec((block_rows, v), lambda i: (i, 0)),
                pl.BlockSpec((block_rows, 1), lambda i: (i, 0)),
            ],
            out_specs=pl.BlockSpec((1, 8, 128), lambda i: (i, 0, 0)),
        ),
        compiler_params=pltpu.CompilerParams(
            dimension_semantics=("parallel",)),
    )(x, tgt2d)

    cross_sum = jnp.sum(partials[:, 0, 0])

    # Hoisted per-row entropy of the smoothed target distribution
    # (0*log(0) -> 0 convention, matching nn.KLDivLoss).
    ent = 0.0
    if confidence > 0.0:
        ent += confidence * math.log(confidence)
    if smooth_val > 0.0:
        ent += (size - 2) * smooth_val * math.log(smooth_val)

    non_pad = jnp.sum(target != padding_idx).astype(jnp.float32)
    return (cross_sum + non_pad * jnp.float32(ent)) / non_pad


def _reference_loss(x, target, *, size, padding_idx, smoothing=0.1):
    """Pure-JAX reference mirroring the PyTorch module."""
    confidence = 1.0 - smoothing
    n, v = x.shape
    col = jnp.arange(v)[None, :]
    tgt = target[:, None]
    td = jnp.where(col == tgt, confidence, smoothing / (size - 2))
    td = jnp.where(col == padding_idx, 0.0, td)
    td = jnp.where(tgt == padding_idx, 0.0, td)
    logp = jax.nn.log_softmax(x.astype(jnp.float32), axis=1)
    kl = jnp.where(td > 0, td * (jnp.log(jnp.maximum(td, 1e-30)) - logp), 0.0)
    non_pad = jnp.sum(target != padding_idx).astype(jnp.float32)
    return jnp.sum(kl) / non_pad


if __name__ == "__main__":
    SIZE = 32          # vocabulary / class count
    PADDING_IDX = 0
    SMOOTHING = 0.1
    N = 8              # number of tokens

    key = jax.random.PRNGKey(0)
    kx, kt = jax.random.split(key)
    x = jax.random.normal(kx, (N, SIZE), dtype=jnp.float32)
    target = jax.random.randint(kt, (N,), 0, SIZE, dtype=jnp.int32)
    # make sure at least one padding token and at least one real token exist
    target = target.at[3].set(PADDING_IDX)
    target = target.at[0].set(5)

    loss = label_smoothing_loss(x, target, size=SIZE,
                                padding_idx=PADDING_IDX, smoothing=SMOOTHING)
    loss = jax.block_until_ready(loss)

    ref = _reference_loss(x, target, size=SIZE,
                          padding_idx=PADDING_IDX, smoothing=SMOOTHING)
    assert jnp.allclose(loss, ref, rtol=1e-4, atol=1e-4), (loss, ref)

    print("KERNEL_OK")
</pallas_src>

<mosaic_0001>
module attributes {stable_mosaic.version = 11 : i64} {
  func.func @_label_smoothing_kernel(%arg0: i32, %arg1: memref<8x32xf32, #tpu.memory_space<vmem>>, %arg2: memref<8x1xi32, #tpu.memory_space<vmem>>, %arg3: memref<1x8x128xf32, #tpu.memory_space<vmem>>) attributes {dimension_semantics = [#tpu.dimension_semantics<parallel>], iteration_bounds = array<i64: 1>, scalar_prefetch = 0 : i64, scratch_operands = 0 : i64, tpu.core_type = #tpu.core_type<tc>, window_params = [{transform_indices = @transform_0, window_bounds = array<i64: 8, 32>}, {transform_indices = @transform_1, window_bounds = array<i64: 8, 1>}, {transform_indices = @transform_2, window_bounds = array<i64: 1, 8, 128>}]} {
    %c0 = arith.constant 0 : index
    %c0_0 = arith.constant 0 : index
    %0 = vector.load %arg1[%c0, %c0_0] : memref<8x32xf32, #tpu.memory_space<vmem>>, vector<8x32xf32>
    %c0_1 = arith.constant 0 : index
    %c0_2 = arith.constant 0 : index
    %1 = vector.load %arg2[%c0_1, %c0_2] : memref<8x1xi32, #tpu.memory_space<vmem>>, vector<8x1xi32>
    %cst = arith.constant dense<0xFF800000> : vector<8xf32>
    %2 = vector.multi_reduction <maximumf>, %0, %cst [1] : vector<8x32xf32> to vector<8xf32>
    %3 = vector.shape_cast %2 : vector<8xf32> to vector<8x1xf32>
    %4 = vector.broadcast %3 : vector<8x1xf32> to vector<8x32xf32>
    %5 = arith.subf %0, %4 : vector<8x32xf32>
    %6 = math.exp %5 : vector<8x32xf32>
    %cst_3 = arith.constant dense<0.000000e+00> : vector<8xf32>
    %7 = vector.multi_reduction <add>, %6, %cst_3 [1] : vector<8x32xf32> to vector<8xf32>
    %8 = vector.shape_cast %7 : vector<8xf32> to vector<8x1xf32>
    %9 = math.log %8 : vector<8x1xf32>
    %10 = arith.addf %3, %9 : vector<8x1xf32>
    %11 = tpu.iota {dimensions = array<i32: 1>} : vector<8x32xi32>
    %12 = vector.broadcast %1 : vector<8x1xi32> to vector<8x32xi32>
    %13 = arith.cmpi eq, %11, %12 : vector<8x32xi32>
    %cst_4 = arith.constant 0.899999976 : f32
    %cst_5 = arith.constant 0.00333333341 : f32
    %14 = vector.broadcast %cst_4 : f32 to vector<8x32xf32>
    %15 = vector.broadcast %cst_5 : f32 to vector<8x32xf32>
    %16 = arith.select %13, %14, %15 : vector<8x32xi1>, vector<8x32xf32>
    %c0_i32 = arith.constant 0 : i32
    %17 = vector.broadcast %c0_i32 : i32 to vector<8x32xi32>
    %18 = arith.cmpi eq, %11, %17 : vector<8x32xi32>
    %cst_6 = arith.constant 0.000000e+00 : f32
    %19 = vector.broadcast %cst_6 : f32 to vector<8x32xf32>
    %20 = arith.select %18, %19, %16 : vector<8x32xi1>, vector<8x32xf32>
    %21 = arith.mulf %20, %0 : vector<8x32xf32>
    %cst_7 = arith.constant dense<0.000000e+00> : vector<8xf32>
    %22 = vector.multi_reduction <add>, %21, %cst_7 [1] : vector<8x32xf32> to vector<8xf32>
    %23 = vector.shape_cast %22 : vector<8xf32> to vector<8x1xf32>
    %24 = arith.subf %23, %10 : vector<8x1xf32>
    %c0_i32_8 = arith.constant 0 : i32
    %25 = vector.broadcast %c0_i32_8 : i32 to vector<8x1xi32>
    %26 = arith.cmpi ne, %1, %25 : vector<8x1xi32>
    %cst_9 = arith.constant 0.000000e+00 : f32
    %27 = vector.broadcast %cst_9 : f32 to vector<8x1xf32>
    %28 = arith.subf %27, %24 : vector<8x1xf32>
    %cst_10 = arith.constant 0.000000e+00 : f32
    %29 = vector.broadcast %cst_10 : f32 to vector<8x1xf32>
    %30 = arith.select %26, %28, %29 : vector<8x1xi1>, vector<8x1xf32>
    %31 = vector.shape_cast %30 : vector<8x1xf32> to vector<1x8x1xf32>
    %cst_11 = arith.constant dense<0.000000e+00> : vector<1xf32>
    %32 = vector.multi_reduction <add>, %31, %cst_11 [1, 2] : vector<1x8x1xf32> to vector<1xf32>
    %33 = vector.shape_cast %32 : vector<1xf32> to vector<1x1x1xf32>
    %34 = vector.extract %33[0, 0, 0] : f32 from vector<1x1x1xf32>
    %35 = vector.broadcast %34 : f32 to vector<1x8x128xf32>
    %c0_12 = arith.constant 0 : index
    %c0_13 = arith.constant 0 : index
    %c0_14 = arith.constant 0 : index
    %36 = vector.load %arg3[%c0_12, %c0_13, %c0_14] : memref<1x8x128xf32, #tpu.memory_space<vmem>>, vector<1x8x128xf32>
    tpu.vector_store %arg3[%c0_12, %c0_13, %c0_14], %35 {strides = array<i32>} : memref<1x8x128xf32, #tpu.memory_space<vmem>>, vector<1x8x128xf32>,
    return
  }
  func.func @transform_0(%arg0: i32) -> (i32, i32) {
    %c0_i32 = arith.constant 0 : i32
    %c0_i32_0 = arith.constant 0 : i32
    return %arg0, %c0_i32 : i32, i32
  }
  func.func @transform_1(%arg0: i32) -> (i32, i32) {
    %c0_i32 = arith.constant 0 : i32
    %c0_i32_0 = arith.constant 0 : i32
    return %arg0, %c0_i32 : i32, i32
  }
  func.func @transform_2(%arg0: i32) -> (i32, i32, i32) {
    %c0_i32 = arith.constant 0 : i32
    %c0_i32_0 = arith.constant 0 : i32
    %c0_i32_1 = arith.constant 0 : i32
    return %arg0, %c0_i32, %c0_i32_0 : i32, i32, i32
  }
}

</mosaic_0001>

<bundles_post_ra>
// kernel: tpu_custom_call.1
= control target key start
LH: loop header
LB: loop body
LE: loop exit
PB: predicated region body
PF: predicated region fallthrough
CT: control target
= control target key end

     0   :  { %vm14_vm0 = vcmask 261120   ;;  %s133_s0 = inlined_call_operand.vmem [shape: f32[8,32], index: 0, kind: input, shape index: {}]   ;;  %s134_s1 = inlined_call_operand.vmem [shape: s32[8,1], index: 1, kind: input, shape index: {}]   ;;  %s135_s2 = inlined_call_operand.hbm [shape: f32[1,8,128], index: 2, kind: output, shape index: {}]  }
   0x1   :  { %v12_v0 = vld [vmem:[%s133_s0] sm:$0xff] }
   0x2   :  { %7 = vsyncpa [#allocation3], 0  ;;  %v15_v1 = vsel %vm14_vm0, %v12_v0, -inf  ;;  %v103_v2 = vmov 0   ;;  %v13_v3 = vld [vmem:[%s134_s1] sm:$0xff]  ;;  %v27_v6 = vlaneseq  ;;  %vm44_vm4 = vcmask 7168  }
   0x3   :  { %76 = vset.pattern.permute.xlu0 %v103_v2  ;;  %v104_v10 = vmov 0.0033333334   ;;  %vm41_vm3 = vcmp.ne.s32.totalorder %v13_v3, 0  ;;  %s105_s0 = smov [#allocation2]  }
   0x4   :  { %16 = vmax.xlane.f32.xlu0 %v15_v1  ;;  %v28_v8 = vand.u32 127, %v27_v6  ;;  %s63_s1 = sshll.u32 %s105_s0, 4  ;;  %s64_s1 = int_to_ptr.vmem [resolvable:$true] %s63_s1 }
   0x5   :  { %s81_s14 = scalar_lea.vmem %s64_s1, 128  ;;  %p86_p1 = scmp.lt.s32.totalorder %s64_s1, %s64_s1 }
   0x6   :  { %vm34_vm2 = vcmp.eq.s32.totalorder %v28_v8, 0  ;;  %p82_p0 = scmp.ne.s32.totalorder %s64_s1, %s81_s14  ;;  %p87_p2 = scmp.lt.s32.totalorder %s81_s14, %s81_s14 }
   0x8   :  { %p88_p3 = por %p87_p2, %p86_p1 }
   0xa   :  { %p89_p4 = pnand %p88_p3, %p82_p0 }
  0x1a   :  { %30 = vperm.xlu0 %76, %v13_v3  }
  0x8d   :  { %v17_v4 = vpop.xlane.xlu0 %16 }
  0x8e   :  { %v18_v5 = vsub.f32 %v12_v0, %v17_v4 }
  0x90   :  { %v19_v7 = vmul.f32 1.442695, %v18_v5 }
  0x92   :  { %77 = vpow2.f32 %v19_v7 }
  0x95   :  { %v31_v9 = vpop.permute.xlu0 %30 }
  0x96   :  { %vm32_vm1 = vcmp.eq.s32.totalorder %v28_v8, %v31_v9 }
  0x97   :  { %v33_v11 = vsel %vm32_vm1, 0.9, %v104_v10 }
  0x98   :  { %v35_v12 = vsel %vm34_vm2, 0.0, %v33_v11 }
  0x99   :  { %v36_v13 = vmul.f32 %v35_v12, %v12_v0 }
  0x9b   :  { %v37_v16 = vsel %vm14_vm0, %v36_v13, 0.0 }
  0x9f   :  { %v78_v14 = vpop.eup %77 }
  0xa0   :  { %v21_v15 = vsel %vm14_vm0, %v78_v14, 0.0 }
  0xa1   :  { %22 = vadd.xlane.f32.xlu1 %v21_v15 }
  0xa5   :  { %38 = vadd.xlane.f32.xlu1 %v37_v16 }
 0x12a   :  { %v23_v17 = vpop.xlane.xlu1 %22 }
 0x12b   :  { %79 = vlog2.f32 %v23_v17 }
 0x12e   :  { %v39_v20 = vpop.xlane.xlu1 %38 }
 0x138   :  { %v80_v18 = vpop.eup %79 }
 0x139   :  { %v25_v19 = vmul.f32 0.6931472, %v80_v18 }
 0x13b   :  { %v26_v21 = vadd.f32 %v25_v19, %v17_v4 }
 0x13d   :  { %v40_v22 = vsub.f32 %v39_v20, %v26_v21 }
 0x13f   :  { %v42_v23 = vsub.f32 0.0, %v40_v22 }
 0x141   :  { %v43_v24 = vsel %vm41_vm3, %v42_v23, 0.0 }
 0x142   :  { %v45_v25 = vsel %vm44_vm4, %v43_v24, 0.0 }
 0x143   :  { %46 = vadd.xlane.f32.xlu1 %v45_v25 }
 0x1cc   :  { %v47_v26 = vpop.xlane.xlu1 %46 }
 0x1cd   :  { %v48_v27 = vrot.slane %v47_v26, 4 }
 0x1cf   :  { %v49_v28 = vadd.f32 %v48_v27, %v47_v26 }
 0x1d1   :  { %v50_v29 = vrot.slane %v49_v28, 2 }
 0x1d3   :  { %v51_v30 = vadd.f32 %v50_v29, %v49_v28 }
 0x1d5   :  { %v52_v31 = vrot.slane %v51_v30, 1 }
 0x1d7   :  { %v53_v32 = vadd.f32 %v52_v31, %v51_v30 }
 0x1d9   :  { %71 = vpush %v53_v32 }
 0x20a   :  { %s72_s13 = spop %71 }
 0x20b   :  { %v55_v33 = vstv %s72_s13 }
 0x20c   :  { %56 = vst [vmem:[#allocation2] sm:$0xff] %v55_v33 }
 0x20d   :  { %92 = shalt.err (!%p89_p4)
}
 0x20e   :  { %66 = dma.vmem_to_hbm [thread:$0]  %s64_s1, 128, %s135_s2, [#allocation3]  }
 0x20f   :  { %101 = dma.done.wait [#allocation3], 128  }
 0x210   :  { %102 = vsyncadd [#allocation3], 4294967168 }
 0x211   :  { %70 = vsyncpa [#allocation3], 1 }

</bundles_post_ra>
